<compile_context>
chip_gen: v7x
topology: tpu7x:2x2x1
jax: 0.10.0
libtpu: 0.0.40
codegen_flags: <defaults>
</compile_context>

<pallas_src>
import numpy as np
import jax
import jax.numpy as jnp
from jax import lax
from jax.experimental import pallas as pl
from jax.experimental.pallas import tpu as pltpu


# ----------------------------------------------------------------------------
# Pallas kernel: fused bilinear upsample + spatial softmax
#   up = R @ conv @ Ct   (bf16 operands, f32 accumulation on the MXU)
#   softmax over all H*W positions (f32; EUP reciprocal + 1 Newton refinement)
# ----------------------------------------------------------------------------
def _dsclrcn_head_kernel(conv_ref, r_ref, ct_ref, out_ref):
    # conv_ref: (NB, H_lf, W_lf) bf16  1x1-conv output (channel dim reduced in XLA)
    # r_ref:    (H, H_lf)        bf16  row interpolation matrix
    # ct_ref:   (W_lf, W)        bf16  column interpolation matrix (transposed)
    # out_ref:  (NB, H, W)       f32   per-sample softmax saliency maps
    r = r_ref[...]
    ct = ct_ref[...]
    nb = out_ref.shape[0]

    def body(n, carry):
        c = conv_ref[n]                                              # (H_lf, W_lf) bf16

        # Bilinear upsample = R @ conv @ Ct; contract the small H_lf dim in the
        # large matmul: tmp = conv @ Ct first, then up = R @ tmp.
        tmp = jnp.dot(c, ct, preferred_element_type=jnp.float32)     # (H_lf, W) f32
        up = jnp.dot(r, tmp.astype(jnp.bfloat16),
                     preferred_element_type=jnp.float32)             # (H, W) f32

        # Softmax over all H*W positions (PyTorch Softmax(dim=2) on (N,1,H*W)).
        m = jnp.max(jnp.max(up, axis=1, keepdims=True),
                    axis=0, keepdims=True)                           # (1, 1)
        e = jnp.exp(up - m)
        s = jnp.sum(jnp.sum(e, axis=1, keepdims=True),
                    axis=0, keepdims=True)                           # (1, 1)
        inv = pl.reciprocal(s, approx=True)                          # EUP slot
        inv = inv * (2.0 - s * inv)       # one Newton step -> sums to 1 at f32 accuracy
        out_ref[n] = e * inv
        return carry

    # fori_loop (not a static unroll) bounds the ~O(H*W) f32 live ranges per
    # sample; the per-iteration loop overhead is negligible vs the matmuls/DMA.
    lax.fori_loop(0, nb, body, 0)


def _vmem_plan(n, h_lf, w_lf, h, w):
    """Pick samples-per-step nb under a conservative VMEM budget and return a
    matching vmem_limit_bytes.  Keeps >=2 parallel grid steps when N >= 2 so
    v7x's two TensorCores both get work; budget is safe on v5e/v6e/v7x."""
    bf16, f32 = 2, 4
    budget = 24 * 1024 * 1024
    const_bytes = 2 * (h * h_lf + w_lf * w) * bf16        # R, Ct (double-buffered)
    interm_bytes = 3 * h * w * f32                        # up/e/store staging (loop-bounded)

    def blocks(nb):                                       # double-buffered in + out blocks
        return 2 * nb * (h_lf * w_lf * bf16 + h * w * f32)

    nb = 1
    for cand in range(1, min(n, 8) + 1):
        if n % cand:
            continue
        if const_bytes + interm_bytes + blocks(cand) > budget:
            continue
        if (n // cand >= 2) or (n == 1):
            nb = cand
    est = const_bytes + interm_bytes + blocks(nb)
    vmem_limit = int(min(max(2 * est, 32 * 1024 * 1024), 56 * 1024 * 1024))
    return nb, vmem_limit


def dsclrcn_head(conv_nhw, R, Ct, input_dim):
    """Fused bilinear-upsample + spatial-softmax head.

    conv_nhw: (N, H_lf, W_lf) bf16 output of the 1x1 conv (channels reduced).
    R:        (H, H_lf) bf16 row interpolation matrix.
    Ct:       (W_lf, W) bf16 column interpolation matrix (transposed).
    Returns (N, 1, H, W) float32 saliency maps (each sums to 1 over H*W).
    """
    N, H_lf, W_lf = conv_nhw.shape
    H, W = input_dim
    nb, vmem_limit = _vmem_plan(N, H_lf, W_lf, H, W)

    # TODO(synk): for single-sample latency on v7x one could add a second grid
    # axis splitting H across the two TensorCores (needs a two-pass softmax).
    out = pl.pallas_call(
        _dsclrcn_head_kernel,
        out_shape=jax.ShapeDtypeStruct((N, H, W), jnp.float32),
        grid=(N // nb,),
        in_specs=[
            pl.BlockSpec((nb, H_lf, W_lf), lambda i: (i, 0, 0)),
            pl.BlockSpec((H, H_lf), lambda i: (0, 0)),
            pl.BlockSpec((W_lf, W), lambda i: (0, 0)),
        ],
        out_specs=pl.BlockSpec((nb, H, W), lambda i: (i, 0, 0)),
        compiler_params=pltpu.CompilerParams(
            dimension_semantics=("parallel",),
            vmem_limit_bytes=vmem_limit),
    )(conv_nhw, R, Ct)

    return out.reshape(N, 1, H, W)


# ----------------------------------------------------------------------------
# Glue: bilinear interpolation matrices (align_corners=False, PyTorch default).
# Built once on the host (numpy) and stored directly in bf16; rows of R and
# columns of Ct each sum to 1 (partition of unity), matching PyTorch.
# ----------------------------------------------------------------------------
def bilinear_matrix(out_size, in_size):
    i = np.arange(out_size, dtype=np.float64)
    src = (i + 0.5) * (in_size / out_size) - 0.5
    src = np.maximum(src, 0.0)
    i0 = np.minimum(np.floor(src).astype(np.int64), in_size - 1)
    i1 = np.minimum(i0 + 1, in_size - 1)
    w1 = src - i0
    w0 = 1.0 - w1
    M = np.zeros((out_size, in_size), dtype=np.float32)
    M[np.arange(out_size), i0] += w0.astype(np.float32)
    M[np.arange(out_size), i1] += w1.astype(np.float32)
    return M


def make_head_constants(input_dim, lf_hw):
    """Build R / Ct once (outside the per-forward path), directly in bf16."""
    H, W = input_dim
    H_lf, W_lf = lf_hw
    R = jnp.asarray(bilinear_matrix(H, H_lf), dtype=jnp.bfloat16)      # (H, H_lf)
    Ct = jnp.asarray(bilinear_matrix(W, W_lf).T, dtype=jnp.bfloat16)   # (W_lf, W)
    return {"R": R, "Ct": Ct}


# ----------------------------------------------------------------------------
# Glue: stand-in local features CNN (3 x [3x3 conv + ReLU + 2x2 maxpool]),
# producing 128 channels at (H/8, W/8) in NHWC (channels-last) directly.
# TODO(synk): LocalFeatsCNN's definition is not included in the provided module
# source; this deterministic stand-in reproduces its interface (128ch, /8).
# ----------------------------------------------------------------------------
def make_local_feats_params(key):
    ks = jax.random.split(key, 6)
    return {
        "w1": jax.random.normal(ks[0], (3, 3, 3, 32), jnp.float32) * 0.1,    # HWIO
        "b1": jax.random.normal(ks[1], (32,), jnp.float32) * 0.01,
        "w2": jax.random.normal(ks[2], (3, 3, 32, 64), jnp.float32) * 0.05,
        "b2": jax.random.normal(ks[3], (64,), jnp.float32) * 0.01,
        "w3": jax.random.normal(ks[4], (3, 3, 64, 128), jnp.float32) * 0.05,
        "b3": jax.random.normal(ks[5], (128,), jnp.float32) * 0.01,
    }


def _conv_relu_pool(x, w, b):
    y = lax.conv_general_dilated(
        x, w, window_strides=(1, 1), padding="SAME",
        dimension_numbers=("NHWC", "HWIO", "NHWC"))
    y = jax.nn.relu(y + b[None, None, None, :])
    y = lax.reduce_window(y, -jnp.inf, lax.max,
                          window_dimensions=(1, 2, 2, 1),
                          window_strides=(1, 2, 2, 1),
                          padding="VALID")
    return y


def local_feats_cnn(params, x_nhwc):
    y = _conv_relu_pool(x_nhwc, params["w1"], params["b1"])
    y = _conv_relu_pool(y, params["w2"], params["b2"])
    y = _conv_relu_pool(y, params["w3"], params["b3"])
    return y  # (N, H/8, W/8, 128) channels-last


# ----------------------------------------------------------------------------
# Full DSCLRCN forward (input stays NCHW to match the PyTorch module interface)
# ----------------------------------------------------------------------------
def dsclrcn_forward(params, consts, x_nchw, input_dim):
    # Only the tiny 3-channel input is transposed; the 128-channel feature map
    # is produced channels-last directly by the CNN (no big NCHW->NHWC pass).
    x_nhwc = jnp.transpose(x_nchw, (0, 2, 3, 1))
    lf_nhwc = local_feats_cnn(params["local_feats"], x_nhwc)   # (N, H/8, W/8, 128)

    # 1x1 conv (128 -> 1) hoisted out of the Pallas kernel: a tiny exact f32
    # channel contraction in XLA.  This cuts the kernel's per-sample HBM bytes
    # by ~128x (bf16 (H_lf,W_lf) map instead of f32 (H_lf,W_lf,128) features).
    w = params["last_conv_w"].reshape(-1).astype(jnp.float32)          # (128,)
    conv = jnp.einsum("nhwc,c->nhw", lf_nhwc, w) + params["last_conv_b"][0]
    conv = conv.astype(jnp.bfloat16)                                   # (N, H_lf, W_lf)

    return dsclrcn_head(conv, consts["R"], consts["Ct"], input_dim)


if __name__ == "__main__":
    key = jax.random.PRNGKey(0)
    k_x, k_lf, k_w, k_b = jax.random.split(key, 4)

    # Small shapes consistent with the module: input_dim=(24, 32), RGB input,
    # local features have 128 channels at an 8x downsampled resolution (3, 4).
    N = 2
    input_dim = (24, 32)
    x = jax.random.normal(k_x, (N, 3, input_dim[0], input_dim[1]), jnp.float32)

    params = {
        "local_feats": make_local_feats_params(k_lf),
        # nn.Conv2d(128, 1, 1): weight (1,128,1,1) stored as (1, 128); bias (1,)
        "last_conv_w": jax.random.normal(k_w, (1, 128), jnp.float32) * 0.05,
        "last_conv_b": jax.random.normal(k_b, (1,), jnp.float32) * 0.01,
    }

    # Bilinear matrices are static given shapes: build once, in bf16, outside
    # the per-forward path.
    lf_hw = (input_dim[0] // 8, input_dim[1] // 8)
    consts = make_head_constants(input_dim, lf_hw)

    fwd = jax.jit(dsclrcn_forward, static_argnums=(3,))
    out = fwd(params, consts, x, input_dim)
    out = jax.block_until_ready(out)

    assert out.shape == (N, 1, input_dim[0], input_dim[1]), out.shape
    # each sample's saliency map is a softmax over spatial positions -> sums to 1
    sums = jnp.sum(out.reshape(N, -1), axis=-1)
    assert bool(jnp.all(jnp.abs(sums - 1.0) < 5e-3)), sums

    print("KERNEL_OK")
</pallas_src>

<mosaic_0001>
module attributes {stable_mosaic.version = 11 : i64} {
  func.func @_dsclrcn_head_kernel(%arg0: i32, %arg1: memref<1x3x4xbf16, #tpu.memory_space<vmem>>, %arg2: memref<24x3xbf16, #tpu.memory_space<vmem>>, %arg3: memref<4x32xbf16, #tpu.memory_space<vmem>>, %arg4: memref<1x24x32xf32, #tpu.memory_space<vmem>>) attributes {dimension_semantics = [#tpu.dimension_semantics<parallel>], iteration_bounds = array<i64: 2>, scalar_prefetch = 0 : i64, scratch_operands = 0 : i64, tpu.core_type = #tpu.core_type<tc>, window_params = [{transform_indices = @transform_0, window_bounds = array<i64: 1, 3, 4>}, {pipeline_mode = #tpu.pipeline_mode<synchronous>, transform_indices = @transform_1, window_bounds = array<i64: 24, 3>}, {pipeline_mode = #tpu.pipeline_mode<synchronous>, transform_indices = @transform_2, window_bounds = array<i64: 4, 32>}, {transform_indices = @transform_3, window_bounds = array<i64: 1, 24, 32>}]} {
    %c0 = arith.constant 0 : index
    %c0_0 = arith.constant 0 : index
    %0 = vector.load %arg2[%c0, %c0_0] : memref<24x3xbf16, #tpu.memory_space<vmem>>, vector<24x3xbf16>
    %c0_1 = arith.constant 0 : index
    %c0_2 = arith.constant 0 : index
    %1 = vector.load %arg3[%c0_1, %c0_2] : memref<4x32xbf16, #tpu.memory_space<vmem>>, vector<4x32xbf16>
    %c0_i32 = arith.constant 0 : i32
    %2 = arith.index_cast %c0_i32 : i32 to index
    %c0_3 = arith.constant 0 : index
    %c0_4 = arith.constant 0 : index
    %3 = vector.load %arg1[%2, %c0_3, %c0_4] : memref<1x3x4xbf16, #tpu.memory_space<vmem>>, vector<1x3x4xbf16>
    %4 = vector.shape_cast %3 : vector<1x3x4xbf16> to vector<3x4xbf16>
    %cst = arith.constant dense<0.000000e+00> : vector<3x32xf32>
    %5 = tpu.matmul %4, %1, %cst {dimension_numbers = #tpu.dot_dimension_numbers<[1], [0], [0], [1], [0, 0, 1, 1], [], []>} : vector<3x4xbf16>, vector<4x32xbf16>, vector<3x32xf32> -> vector<3x32xf32>
    %6 = arith.truncf %5 : vector<3x32xf32> to vector<3x32xbf16>
    %cst_5 = arith.constant dense<0.000000e+00> : vector<24x32xf32>
    %7 = tpu.matmul %0, %6, %cst_5 {dimension_numbers = #tpu.dot_dimension_numbers<[1], [0], [0], [1], [0, 0, 1, 1], [], []>} : vector<24x3xbf16>, vector<3x32xbf16>, vector<24x32xf32> -> vector<24x32xf32>
    %cst_6 = arith.constant dense<0xFF800000> : vector<24xf32>
    %8 = vector.multi_reduction <maximumf>, %7, %cst_6 [1] : vector<24x32xf32> to vector<24xf32>
    %9 = vector.shape_cast %8 : vector<24xf32> to vector<24x1xf32>
    %cst_7 = arith.constant dense<0xFF800000> : vector<1xf32>
    %10 = vector.multi_reduction <maximumf>, %9, %cst_7 [0] : vector<24x1xf32> to vector<1xf32>
    %11 = vector.shape_cast %10 : vector<1xf32> to vector<1x1xf32>
    %12 = vector.broadcast %11 : vector<1x1xf32> to vector<24x32xf32>
    %13 = arith.subf %7, %12 : vector<24x32xf32>
    %14 = math.exp %13 : vector<24x32xf32>
    %cst_8 = arith.constant dense<0.000000e+00> : vector<24xf32>
    %15 = vector.multi_reduction <add>, %14, %cst_8 [1] : vector<24x32xf32> to vector<24xf32>
    %16 = vector.shape_cast %15 : vector<24xf32> to vector<24x1xf32>
    %cst_9 = arith.constant dense<0.000000e+00> : vector<1xf32>
    %17 = vector.multi_reduction <add>, %16, %cst_9 [0] : vector<24x1xf32> to vector<1xf32>
    %18 = vector.shape_cast %17 : vector<1xf32> to vector<1x1xf32>
    %19 = tpu.reciprocal %18 {approx = true} : vector<1x1xf32> -> vector<1x1xf32>
    %20 = arith.mulf %18, %19 : vector<1x1xf32>
    %cst_10 = arith.constant 2.000000e+00 : f32
    %21 = vector.broadcast %cst_10 : f32 to vector<1x1xf32>
    %22 = arith.subf %21, %20 : vector<1x1xf32>
    %23 = arith.mulf %19, %22 : vector<1x1xf32>
    %24 = vector.broadcast %23 : vector<1x1xf32> to vector<24x32xf32>
    %25 = arith.mulf %14, %24 : vector<24x32xf32>
    %26 = arith.index_cast %c0_i32 : i32 to index
    %c0_11 = arith.constant 0 : index
    %c0_12 = arith.constant 0 : index
    %27 = vector.load %arg4[%26, %c0_11, %c0_12] : memref<1x24x32xf32, #tpu.memory_space<vmem>>, vector<1x24x32xf32>
    %28 = vector.shape_cast %27 : vector<1x24x32xf32> to vector<24x32xf32>
    %29 = vector.shape_cast %25 : vector<24x32xf32> to vector<1x24x32xf32>
    tpu.vector_store %arg4[%26, %c0_11, %c0_12], %29 {strides = array<i32>} : memref<1x24x32xf32, #tpu.memory_space<vmem>>, vector<1x24x32xf32>,
    %c1_i32 = arith.constant 1 : i32
    return
  }
  func.func @transform_0(%arg0: i32) -> (i32, i32, i32) {
    %c0_i32 = arith.constant 0 : i32
    %c0_i32_0 = arith.constant 0 : i32
    %c0_i32_1 = arith.constant 0 : i32
    return %arg0, %c0_i32, %c0_i32_0 : i32, i32, i32
  }
  func.func @transform_1(%arg0: i32) -> (i32, i32) {
    %c0_i32 = arith.constant 0 : i32
    %c0_i32_0 = arith.constant 0 : i32
    %c0_i32_1 = arith.constant 0 : i32
    return %c0_i32, %c0_i32_0 : i32, i32
  }
  func.func @transform_2(%arg0: i32) -> (i32, i32) {
    %c0_i32 = arith.constant 0 : i32
    %c0_i32_0 = arith.constant 0 : i32
    %c0_i32_1 = arith.constant 0 : i32
    return %c0_i32, %c0_i32_0 : i32, i32
  }
  func.func @transform_3(%arg0: i32) -> (i32, i32, i32) {
    %c0_i32 = arith.constant 0 : i32
    %c0_i32_0 = arith.constant 0 : i32
    %c0_i32_1 = arith.constant 0 : i32
    return %arg0, %c0_i32, %c0_i32_0 : i32, i32, i32
  }
}

</mosaic_0001>

<bundles_post_ra>
// kernel: dsclrcn_forward.1
= control target key start
LH: loop header
LB: loop body
LE: loop exit
PB: predicated region body
PF: predicated region fallthrough
CT: control target
= control target key end

     0   :  { %8 = vsyncpa [#allocation3], 0  ;;  %s719_s0 = inlined_call_operand.vmem [shape: bf16[2,3,4], index: 0, kind: input, shape index: {}]   ;;  %s720_s1 = inlined_call_operand.vmem [shape: bf16[24,3], index: 1, kind: input, shape index: {}]   ;;  %s721_s2 = inlined_call_operand.vmem [shape: bf16[4,32], index: 2, kind: input, shape index: {}]   ;;  %s722_s3 = inlined_call_operand.hbm [shape: f32[2,24,32], index: 3, kind: output, shape index: {}]  }
   0x1   :  { %10 = vsyncpa [#allocation3 + $0x1], 0  ;;  %s596_s12 = smov 0   ;;  %s598_s13 = smov 0  }
   0x2   :  { %s600_s14 = smov 0   ;;  %s602_s15 = smov 0  }
   0x3 LB: > { %s617_s16 = sadd.s32 4294967295, %s568_s15   ;;  %s420_s17 = sadd.s32 4294967294, %s568_s15   ;;  %s568_s15 = sphi %s602_s15, %s728_s15   ;;  %s564_s14 = sphi %s600_s14, %s727_s14   ;;  %s560_s13 = sphi %s598_s13, %s726_s13   ;;  %s556_s12 = sphi %s596_s12, %s725_s12  }
   0x4   : > { %s621_s18 = sadd.s32 1, %s568_s15   ;;  %s91_s19 = sadd.s32 1, %s564_s14 }
   0x5   : > { %s88_s20 = ssub.s32 %s568_s15, %s621_s18  ;;  %p101_p0 = scmp.ne.s32.totalorder %s564_s14, %s560_s13 }
   0x6   : > { %p89_p1 = scmp.eq.s32.totalorder %s88_s20, 0  ;;  %p102_p2 = scmp.eq.s32.totalorder %s617_s16, 1 }
   0x7   : > { %p107_p3 = scmp.ne.s32.totalorder %s560_s13, %s556_s12  ;;  %p108_p4 = scmp.eq.s32.totalorder %s420_s17, 1 }
   0x8   : > { %s632_s21 = scalar_select %p89_p1, %s564_s14, %s91_s19  }
   0x9   : > { %p634_p5 = por %p102_p2, %p101_p0  ;;  %p638_p6 = por %p108_p4, %p107_p3 }
   0xa   : > { %p423_p7 = scmp.ge.s32.totalorder %s568_s15, 1  ;;  %p139_p8 = scmp.lt.s32.totalorder %s568_s15, 3 }
   0xc   : > { %p140_p9 = pnand %p423_p7, %p139_p8 }
   0xd   : > { %v170_v0 = vld [vmem:[%s721_s2] sm:$0x3] (!%p140_p9)  ;;  %vm176_vm0 = vcmask (!%p140_p9), 1041408   ;;  %p162_p10 = scmp.lt.s32.totalorder (!%p140_p9), %s617_s16, 1  ;;  %v570_v1 = vmov (!%p140_p9), 0.0   ;;  %vm571_vm1 = vmmov (!%p140_p9), 0  }
   0xe   : > { %143 = sbr.rel (%p140_p9) target bundleno = 834 (0x342), region = 32  ;;  %438 = vmatprep.subr.bf16.mxu0 (!%p140_p9), %v570_v1  ;;  %v178_v2 = vsel (!%p140_p9), %vm176_vm0, %v170_v0, 0  ;;  %440 = vmatprep.mubr.msk.bf16.mxu0 (!%p140_p9), %vm571_vm1, %v570_v1  ;;  %vm172_vm2 = vcmask (!%p140_p9), 31744   ;;  %v496_v4 = vld [vmem:[%s720_s1] sm:$0xff] (!%p140_p9)   ;;  %vm229_vm3 = vcmask (!%p140_p9), 23552   ;;  %vm236_vm4 = vcmask (!%p140_p9), 1040384  }
   0xf   : > { %439 = vmatpush3.bf16.msra.mxu0 (!%p140_p9), %v178_v2  ;;  %446 = vmatprep.mubr.msk.bf16.mxu1 (!%p140_p9), %vm229_vm3, %v496_v4  ;;  %v572_v5 = vmov (!%p140_p9), 65535   ;;  %v497_v14 = vld [vmem:[%s720_s1 + $0x8] ss:$0 sps:$4 sm:$0xff] (!%p140_p9)   ;;  %vm290_vm5 = vcmask (!%p140_p9), 261120   ;;  %s159_s8 = sand.u32 (!%p140_p9), 1, %s560_s13   ;;  %s451_s10 = smul.u32 (!%p140_p9), 384, %s617_s16 }
  0x10   : > { %v237_v6 = vsel (!%p140_p9), %vm236_vm4, 4294967295, %v572_v5  ;;  %s450_s9 = smul.u32 (!%p140_p9), 24, %s159_s8 }
  0x11   : > { %v238_v8 = vsel (!%p140_p9), %vm176_vm0, %v237_v6, 0  ;;  %s671_s24 = scalar_lea.hbm (!%p140_p9), %s722_s3, %s451_s10 }
  0x12   : > { %s161_s11 = scalar_lea.vmem (!%p140_p9), [#allocation2], %s450_s9 }
  0x13   : > { %s358_s17 = sshll.u32 (!%p140_p9), %s161_s11, 4  ;;  %s673_s17 = int_to_ptr.vmem [resolvable:$true] %s358_s17 }
  0x14   : > { %s506_s25 = scalar_lea.vmem (!%p140_p9), %s673_s17, 384 }
  0x15   : > { %s163_s26 = scalar_select %p162_p10, %s617_s16, 1 }
  0x16   : > { %s678_s16 = scalar_lea.sflag [#allocation3], %s159_s8  ;;  %p507_p11 = scmp.ne.s32.totalorder %s673_s17, %s506_s25 }
  0x17   : > { %s424_s27 = sshll.u32 %s163_s26, 1  ;;  %s573_s26 = smov [#allocation2]  }
  0x18   : > { %s165_s30 = scalar_lea.vmem %s719_s0, %s424_s27  ;;  %p508_p12 = pnand %p507_p11, %p634_p5 }
  0x19   : > { %v171_v3 = vld [vmem:[%s165_s30] sm:$0x3]  ;;  %s510_s27 = sshll.u32 %s573_s26, 4  ;;  %s511_s27 = int_to_ptr.vmem [resolvable:$false] %s510_s27 }
  0x1a   : > { %441 = vmatmul.mubr.msk.bf16.vlgmr.msra.gmra.mrb[0].mxu0 %vm172_vm2, %v171_v3  ;;  %p509_p13 = pneg %p508_p12  ;;  %s512_s28 = scalar_lea.vmem %s511_s27, 768 }
  0x1b   : > { %p513_p0 = scmp.lt.s32.totalorder %s673_s17, %s511_s27  ;;  %p514_p1 = scmp.lt.s32.totalorder %s512_s28, %s506_s25 }
  0x1d   : > { %p515_p2 = por %p514_p1, %p513_p0 }
  0x1f   : > { %p516_p3 = pnand %p515_p2, %p509_p13 }
  0xed   : > { %v214_v7 = vpop.f32.mrb[0].mxu0 }
  0xee   : > { %v220_v9 = vpack.c.bf16 %v214_v7, %v214_v7  ;;  %v442_v10 = vpop.f32.mrb[1].mxu0 }
  0xef   : > { %v217_v11 = vpop.f32.mrb[2].mxu0 }
  0xf0   : > { %v443_v12 = vpop.f32.mrb[3].mxu0  ;;  %v240_v13 = vand.u32 %v238_v8, %v220_v9 }
  0xf2   : > { %444 = vmatprep.subr.bf16.mxu1 %v240_v13 }
  0xf3   : > { %445 = vmatpush3.bf16.msra.mxu1 %v240_v13 }
  0xf6   : > { %447 = vmatmul.mubr.msk.bf16.vlgmr.msra.gmra.mrb[0].mxu1 %vm229_vm3, %v497_v14 }
 0x1c9   : > { %v448_v15 = vpop.f32.mrb[0].mxu1 }
 0x1ca   : > { %v276_v16 = vpop.f32.mrb[1].mxu1  ;;  %v297_v17 = vsel %vm290_vm5, %v448_v15, -inf }
 0x1cb   : > { %298 = vmax.xlane.f32.xlu1 %v297_v17  ;;  %v449_v18 = vpop.f32.mrb[2].mxu1  ;;  %v291_v19 = vsel %vm290_vm5, %v276_v16, -inf }
 0x1cc   : > { %292 = vmax.xlane.f32.xlu0 %v291_v19  ;;  %v279_v20 = vpop.f32.mrb[3].mxu1 }
 0x1cd   : > { %v294_v21 = vsel %vm290_vm5, %v279_v20, -inf }
 0x1d0   : > { %295 = vmax.xlane.f32.xlu0 %v294_v21 }
 0x258   : > { %v299_v25 = vpop.xlane.xlu1 %298 }
 0x259   : > { %v293_v22 = vpop.xlane.xlu0 %292 }
 0x25d   : > { %v296_v23 = vpop.xlane.xlu0 %295 }
 0x25e   : > { %v300_v24 = vmax.f32 %v293_v22, %v296_v23 }
 0x260   : > { %v301_v26 = vmax.f32 %v300_v24, %v299_v25 }
 0x262   : > { %v302_v27 = vrot.slane %v301_v26, 4 }
 0x264   : > { %v303_v28 = vmax.f32 %v301_v26, %v302_v27 }
 0x266   : > { %v304_v29 = vrot.slane %v303_v28, 2 }
 0x268   : > { %v305_v30 = vmax.f32 %v303_v28, %v304_v29 }
 0x26a   : > { %v306_v31 = vrot.slane %v305_v30, 1 }
 0x26c   : > { %v307_v32 = vmax.f32 %v305_v30, %v306_v31 }
 0x26e   : > { %v309_v33 = vsub.f32 %v279_v20, %v307_v32  ;;  %v308_v34 = vsub.f32 %v276_v16, %v307_v32  ;;  %v310_v35 = vsub.f32 %v448_v15, %v307_v32 }
 0x270   : > { %v313_v36 = vmul.f32 1.442695, %v309_v33  ;;  %v311_v37 = vmul.f32 1.442695, %v308_v34  ;;  %v315_v38 = vmul.f32 1.442695, %v310_v35 }
 0x272   : > { %498 = vpow2.f32 %v313_v36 }
 0x273   : > { %500 = vpow2.f32 %v311_v37 }
 0x274   : > { %502 = vpow2.f32 %v315_v38 }
 0x27c   : > { %v499_v39 = vpop.eup %498 }
 0x27d   : > { %v501_v40 = vpop.eup %500  ;;  %v320_v41 = vsel %vm290_vm5, %v499_v39, 0.0 }
 0x27e   : > { %321 = vadd.xlane.f32.xlu0 %v320_v41  ;;  %v317_v42 = vsel %vm290_vm5, %v501_v40, 0.0  ;;  %v503_v43 = vpop.eup %502 }
 0x27f   : > { %318 = vadd.xlane.f32.xlu1 %v317_v42  ;;  %v323_v44 = vsel %vm290_vm5, %v503_v43, 0.0 }
 0x283   : > { %324 = vadd.xlane.f32.xlu1 %v323_v44 }
 0x30b   : > { %v322_v45 = vpop.xlane.xlu0 %321 }
 0x30c   : > { %v319_v46 = vpop.xlane.xlu1 %318 }
 0x30d   : > { %v326_v47 = vadd.f32 %v322_v45, %v319_v46 }
 0x310   : > { %v325_v48 = vpop.xlane.xlu1 %324 }
 0x311   : > { %v327_v49 = vadd.f32 %v326_v47, %v325_v48 }
 0x313   : > { %v328_v50 = vrot.slane %v327_v49, 4 }
 0x315   : > { %v329_v51 = vadd.f32 %v328_v50, %v327_v49 }
 0x317   : > { %v330_v52 = vrot.slane %v329_v51, 2 }
 0x319   : > { %v331_v53 = vadd.f32 %v330_v52, %v329_v51 }
 0x31b   : > { %v332_v54 = vrot.slane %v331_v53, 1 }
 0x31d   : > { %v333_v55 = vadd.f32 %v332_v54, %v331_v53 }
 0x31f   : > { %504 = vrcp.f32 %v333_v55 }
 0x329   : > { %v505_v56 = vpop.eup %504 }
 0x32a   : > { %v335_v57 = vmul.f32 %v505_v56, %v333_v55 }
 0x32c   : > { %v336_v58 = vsub.f32 2.0, %v335_v57 }
 0x32e   : > { %v337_v59 = vmul.f32 %v505_v56, %v336_v58 }
 0x330   : > { %v338_v60 = vmul.f32 %v501_v40, %v337_v59  ;;  %v339_v61 = vmul.f32 %v499_v39, %v337_v59  ;;  %v340_v62 = vmul.f32 %v503_v43, %v337_v59 }
 0x332   : > { %341 = vst.msk [vmem:[%s161_s11] sm:$0xff] %vm290_vm5, %v338_v60  ;;  %342 = vst.msk [vmem:[%s161_s11 + $0x8] sm:$0xff] %vm290_vm5, %v339_v61 }
 0x333   : > { %343 = vst.msk [vmem:[%s161_s11 + $0x10] sm:$0xff] %vm290_vm5, %v340_v62 }
 0x334   : > { %519 = shalt.err (!%p516_p3)
}
 0x335   : > { %s520_s29 = scalar_lea.hbm %s671_s24, 384  ;;  %s524_s5 = scalar_lea.hbm %s722_s3, 768 }
 0x336   : > { %p521_p4 = scmp.ne.s32.totalorder %s671_s24, %s520_s29  ;;  %p525_p9 = scmp.lt.u32.totalorder %s671_s24, %s722_s3 }
 0x337   : > { %p526_p10 = scmp.lt.u32.totalorder %s524_s5, %s520_s29  ;;  %p528_p12 = scmp.lt.u32.totalorder %s520_s29, %s671_s24 }
 0x338   : > { %p522_p7 = pnand %p521_p4, %p634_p5 }
 0x339   : > { %p527_p11 = por %p526_p10, %p525_p9 }
 0x33a   : > { %p523_p8 = pneg %p522_p7 }
 0x33b   : > { %p529_p13 = por %p528_p12, %p527_p11 }
 0x33d   : > { %p530_p0 = pnand %p529_p13, %p523_p8 }
 0x33f   : > { %533 = shalt.err (!%p530_p0)
}
 0x340   : > { %s574_s8 = smov 128   ;;  %s575_s9 = smov 8  }
 0x341   : > { %452 = dma.vmem_to_hbm [thread:$0]  (%p634_p5), %s673_s17, 384, %s671_s24, %s678_s16, %s574_s8, %s574_s8, %s575_s9  }
 0x342 PF: > { %p458_p1 = scmp.ge.s32.totalorder %s568_s15, 2  ;;  %s373_s10 = sand.u32 1, %s556_s12  }
 0x343   : > { %s374_s11 = scalar_lea.sflag [#allocation3], %s373_s10 }
 0x344   : > { %p455_p2 = pnand %p458_p1, %p638_p6 }
 0x346   : > { %551 = dma.done.wait (!%p455_p2), %s374_s11, 384  }
 0x347   : > { %553 = vsyncadd (!%p455_p2), %s374_s11, 4294966912  ;;  %p13_p3 = scmp.ge.s32.totalorder %s621_s18, 4   ;;  %s725_s12 = smov %s560_s13 }
 0x348   : > { %s726_s13 = smov %s564_s14  ;;  %s727_s14 = smov %s632_s21 }
 0x349   : > { %s728_s15 = smov %s621_s18  ;;  %15 = sbr.rel (!%p13_p3) target bundleno = 3 (0x3), region = 67 }
 0x350   :  { %379 = vsyncpa [#allocation3], 1 }
 0x351   :  { %381 = vsyncpa [#allocation3 + $0x1], 1 }

</bundles_post_ra>
